<compile_context>
chip_gen: v7x
topology: tpu7x:2x2x1
jax: 0.10.0
libtpu: 0.0.40
codegen_flags: <defaults>
</compile_context>

<pallas_src>
import functools

import jax
import jax.numpy as jnp
import numpy as np
from jax import lax
from jax.experimental import pallas as pl
from jax.experimental.pallas import tpu as pltpu

_VMEM_BUDGET = 40 * 1024 * 1024   # bound for streamed blocks when picking the time chunk
_VMEM_LIMIT = 48 * 1024 * 1024    # scoped-VMEM limit passed to Mosaic (safe on v5e/v6e/v7x)


def _round_up(n, m):
    return ((n + m - 1) // m) * m


def _lstm_kernel(xp_ref, h0_ref, c0_ref, whh_hbm,
                 out_ref, hT_ref, cT_ref,
                 h_sc, c_sc, whh_sc, whh_sem,
                 *, tc, hidden, t_real, needs_mask):
    """One grid step = `tc` LSTM time steps.

    xp_ref : (tc, Bp, Gp) matmul_dtype — precomputed x@W_ih^T + b, packed-gate layout
    whh_hbm: (H, Gp)      matmul_dtype — recurrent weights, left in HBM (pl.ANY)
    whh_sc : (H, Gp)      VMEM scratch — single resident copy (manual DMA at tb==0)
    h_sc/c_sc: (Bp, H) f32 VMEM scratch carrying state across grid steps.
    """
    tb = pl.program_id(0)
    last = pl.num_programs(0) - 1
    H = hidden

    @pl.when(tb == 0)
    def _():
        # Single-buffered resident weight: one manual DMA instead of a
        # double-buffered BlockSpec pipeline (halves the W_hh VMEM footprint).
        cp = pltpu.make_async_copy(whh_hbm, whh_sc, whh_sem)
        cp.start()
        cp.wait()
        h_sc[...] = h0_ref[...]
        c_sc[...] = c0_ref[...]

    def make_step(masked):
        def step_fn(s, carry):
            h_prev, c_prev = carry
            # Recurrent matmul on the MXU: narrow operands, f32 accumulation.
            # Load W_hh^T inside the step (from VMEM scratch) so the compiler is
            # free to keep it MXU-staged rather than pinning vregs across the
            # unrolled loop.
            gates = xp_ref[s].astype(jnp.float32) + jnp.dot(
                h_prev.astype(whh_sc.dtype), whh_sc[...],
                preferred_element_type=jnp.float32)
            # PyTorch gate order [i, f, g, o]; gates packed at H-lane offsets
            # (non-128-aligned slices only cost idle-XLU lane shifts).
            i_g = jax.nn.sigmoid(gates[:, 0 * H:1 * H])
            f_g = jax.nn.sigmoid(gates[:, 1 * H:2 * H])
            g_g = jnp.tanh(gates[:, 2 * H:3 * H])
            o_g = jax.nn.sigmoid(gates[:, 3 * H:4 * H])
            c_new = f_g * c_prev + i_g * g_g
            h_new = o_g * jnp.tanh(c_new)
            if masked:  # traced only for the (single) possibly-ragged last block
                valid = (tb * tc + s) < t_real
                c_new = jnp.where(valid, c_new, c_prev)
                h_new = jnp.where(valid, h_new, h_prev)
            out_ref[s] = h_new.astype(out_ref.dtype)
            return h_new, c_new
        return step_fn

    def run_block(masked):
        h, c = lax.fori_loop(0, tc, make_step(masked),
                             (h_sc[...], c_sc[...]), unroll=True)
        h_sc[...] = h
        c_sc[...] = c

    if needs_mask:
        # Only the last block can be ragged: keep the per-step mask off the
        # serial critical path of every other block.
        @pl.when(tb != last)
        def _():
            run_block(False)

        @pl.when(tb == last)
        def _():
            run_block(True)
    else:
        run_block(False)

    # Final states: written once, on the last grid step, always in f32.
    @pl.when(tb == last)
    def _():
        hT_ref[...] = h_sc[...].astype(hT_ref.dtype)
        cT_ref[...] = c_sc[...].astype(cT_ref.dtype)


class LSTMLayerPallas:
    """Pallas-TPU equivalent of LSTMLayer (nn.LSTM, batch_first=True, num_layers=1)."""

    def __init__(self, params, *, matmul_dtype=jnp.bfloat16, out_dtype=None,
                 time_chunk=32, time_major_output=False):
        w_ih = jnp.asarray(params["w_ih"], jnp.float32)              # (4H, I)
        w_hh = jnp.asarray(params["w_hh"], jnp.float32)              # (4H, H)
        bias = (jnp.asarray(params["b_ih"], jnp.float32)
                + jnp.asarray(params["b_hh"], jnp.float32))          # (4H,)
        four_h, input_size = w_ih.shape
        H = four_h // 4
        Gp = _round_up(4 * H, 128)          # packed gate width (only total padded)

        self.H = H
        self.I = input_size
        self.Gp = Gp
        self.matmul_dtype = matmul_dtype
        self.out_dtype = matmul_dtype if out_dtype is None else out_dtype
        self.time_chunk = int(time_chunk)
        self.time_major_output = bool(time_major_output)

        # Pre-transposed / padded ONCE. Packed-gate layout: gate k occupies
        # columns [k*H, (k+1)*H) of the Gp-wide preactivation.
        self.wih_t = (jnp.zeros((input_size, Gp), jnp.float32)
                      .at[:, :4 * H].set(w_ih.T).astype(matmul_dtype))   # (I, Gp)
        self.whh_t = (jnp.zeros((H, Gp), jnp.float32)
                      .at[:, :4 * H].set(w_hh.T).astype(matmul_dtype))   # (H, Gp)
        self.bias = jnp.zeros((Gp,), jnp.float32).at[:4 * H].set(bias)   # f32

    def _pick_time_chunk(self, T, Bp):
        xp_b = jnp.dtype(self.matmul_dtype).itemsize
        out_b = jnp.dtype(self.out_dtype).itemsize
        fixed = (self.H * self.Gp * xp_b          # resident W_hh^T (single-buffered)
                 + 8 * Bp * self.H * 4)           # h0/c0/hT/cT blocks + h/c scratch (f32)
        tc = max(1, min(self.time_chunk, T))
        while tc > 1 and fixed + 2 * tc * Bp * (self.Gp * xp_b + self.H * out_b) > _VMEM_BUDGET:
            tc = max(1, tc // 2)
        return tc

    def __call__(self, x, hidden):
        h0, c0 = hidden                              # each (1, B, H)
        B, T, I = x.shape
        H, Gp = self.H, self.Gp
        assert I == self.I and h0.shape[-1] == H

        # Sublane-align the batch for the narrowest streamed dtype (bf16 -> 16 rows).
        min_bytes = min(jnp.dtype(self.matmul_dtype).itemsize,
                        jnp.dtype(self.out_dtype).itemsize, 4)
        sub = max(8, 32 // min_bytes)
        Bp = _round_up(max(B, sub), sub)

        TC = self._pick_time_chunk(T, Bp)
        n_blocks = (T + TC - 1) // TC
        Tp = n_blocks * TC

        # Pad x BEFORE the projection so the big matmul writes the padded
        # (Tp, Bp, Gp) buffer directly, then keep the preactivation stream in the
        # narrow matmul dtype: it is the dominant HBM read of the recurrent kernel.
        x_tm = jnp.transpose(x, (1, 0, 2)).astype(self.matmul_dtype)        # (T, B, I)
        x_pad = jnp.zeros((Tp, Bp, I), self.matmul_dtype).at[:T, :B, :].set(x_tm)
        xp = (jnp.dot(x_pad.reshape(Tp * Bp, I), self.wih_t,
                      preferred_element_type=jnp.float32)
              + self.bias).astype(self.matmul_dtype).reshape(Tp, Bp, Gp)

        h0_p = jnp.zeros((Bp, H), jnp.float32).at[:B, :].set(h0[0].astype(jnp.float32))
        c0_p = jnp.zeros((Bp, H), jnp.float32).at[:B, :].set(c0[0].astype(jnp.float32))

        kernel = functools.partial(_lstm_kernel, tc=TC, hidden=H, t_real=T,
                                   needs_mask=(Tp != T))

        out_tm, hT, cT = pl.pallas_call(
            kernel,
            grid=(n_blocks,),
            in_specs=[
                pl.BlockSpec((TC, Bp, Gp), lambda tb: (tb, 0, 0)),   # xp block (streamed)
                pl.BlockSpec((Bp, H), lambda tb: (0, 0)),            # h0 (resident)
                pl.BlockSpec((Bp, H), lambda tb: (0, 0)),            # c0 (resident)
                pl.BlockSpec(memory_space=pl.ANY),                   # W_hh^T (manual DMA)
            ],
            out_specs=[
                pl.BlockSpec((TC, Bp, H), lambda tb: (tb, 0, 0)),    # out block (time-major)
                pl.BlockSpec((Bp, H), lambda tb: (0, 0)),            # h_T
                pl.BlockSpec((Bp, H), lambda tb: (0, 0)),            # c_T
            ],
            out_shape=[
                jax.ShapeDtypeStruct((Tp, Bp, H), self.out_dtype),
                jax.ShapeDtypeStruct((Bp, H), jnp.float32),
                jax.ShapeDtypeStruct((Bp, H), jnp.float32),
            ],
            scratch_shapes=[
                pltpu.VMEM((Bp, H), jnp.float32),           # h carry (f32)
                pltpu.VMEM((Bp, H), jnp.float32),           # c carry (f32)
                pltpu.VMEM((H, Gp), self.matmul_dtype),     # resident W_hh^T (1 copy)
                pltpu.SemaphoreType.DMA(()),                # DMA completion semaphore
            ],
            compiler_params=pltpu.CompilerParams(
                dimension_semantics=("arbitrary",),          # time recurrence is serial
                vmem_limit_bytes=_VMEM_LIMIT),
        )(xp, h0_p, c0_p, self.whh_t)

        out_tm = out_tm[:T, :B, :]
        # Kernel stores stay time-major/lane-dense; batch-first conversion (PyTorch
        # semantics) happens here. Set time_major_output=True to skip it entirely.
        out = out_tm if self.time_major_output else jnp.transpose(out_tm, (1, 0, 2))
        return out, (hT[:B, :][None], cT[:B, :][None])


def lstm_layer_forward(x, hidden, params, **kwargs):
    """Functional convenience wrapper (prefer building LSTMLayerPallas once)."""
    return LSTMLayerPallas(params, **kwargs)(x, hidden)


def _lstm_reference(x, hidden, params):
    """Pure-JAX f32 reference (lax.scan) mirroring PyTorch nn.LSTM."""
    h0, c0 = hidden
    w_ih, w_hh = params["w_ih"], params["w_hh"]
    b = params["b_ih"] + params["b_hh"]
    H = h0.shape[-1]

    def step(carry, x_t):
        h, c = carry
        gates = x_t @ w_ih.T + h @ w_hh.T + b
        i = jax.nn.sigmoid(gates[:, 0 * H:1 * H])
        f = jax.nn.sigmoid(gates[:, 1 * H:2 * H])
        g = jnp.tanh(gates[:, 2 * H:3 * H])
        o = jax.nn.sigmoid(gates[:, 3 * H:4 * H])
        c_new = f * c + i * g
        h_new = o * jnp.tanh(c_new)
        return (h_new, c_new), h_new

    (hT, cT), out_tm = lax.scan(step, (h0[0], c0[0]), jnp.transpose(x, (1, 0, 2)))
    return jnp.transpose(out_tm, (1, 0, 2)), (hT[None], cT[None])


def _f32(a):
    return np.asarray(jnp.asarray(a, jnp.float32))


if __name__ == "__main__":
    # Small, deterministic shapes.
    B, T, I, H = 2, 8, 16, 32
    num_layers = 1

    key = jax.random.PRNGKey(0)
    kx, kh, kc, k1, k2, k3, k4 = jax.random.split(key, 7)

    x = jax.random.normal(kx, (B, T, I), dtype=jnp.float32)
    h0 = jax.random.normal(kh, (num_layers, B, H), dtype=jnp.float32)
    c0 = jax.random.normal(kc, (num_layers, B, H), dtype=jnp.float32)

    # PyTorch nn.LSTM parameter shapes; uniform(-k, k), k = 1/sqrt(H).
    bound = 1.0 / np.sqrt(H)
    params = {
        "w_ih": jax.random.uniform(k1, (4 * H, I), jnp.float32, -bound, bound),
        "w_hh": jax.random.uniform(k2, (4 * H, H), jnp.float32, -bound, bound),
        "b_ih": jax.random.uniform(k3, (4 * H,), jnp.float32, -bound, bound),
        "b_hh": jax.random.uniform(k4, (4 * H,), jnp.float32, -bound, bound),
    }

    out_r, (hT_r, cT_r) = _lstm_reference(x, (h0, c0), params)

    # 1) Exact-semantics check: f32 operands, tight tolerance (TC divides T => no mask).
    layer_f32 = LSTMLayerPallas(params, matmul_dtype=jnp.float32)
    out32, (hT32, cT32) = layer_f32(x, (h0, c0))
    jax.block_until_ready((out32, hT32, cT32))
    assert out32.shape == (B, T, H) and hT32.shape == (1, B, H) and cT32.shape == (1, B, H)
    np.testing.assert_allclose(_f32(out32), np.asarray(out_r), atol=1e-4, rtol=1e-4)
    np.testing.assert_allclose(_f32(hT32), np.asarray(hT_r), atol=1e-4, rtol=1e-4)
    np.testing.assert_allclose(_f32(cT32), np.asarray(cT_r), atol=1e-4, rtol=1e-4)

    # 2) Ragged-time path: time_chunk that does not divide T (exercises the masked block).
    layer_rag = LSTMLayerPallas(params, matmul_dtype=jnp.float32, time_chunk=5)
    out_rg, (hT_rg, cT_rg) = layer_rag(x, (h0, c0))
    jax.block_until_ready((out_rg, hT_rg, cT_rg))
    np.testing.assert_allclose(_f32(out_rg), np.asarray(out_r), atol=1e-4, rtol=1e-4)
    np.testing.assert_allclose(_f32(hT_rg), np.asarray(hT_r), atol=1e-4, rtol=1e-4)
    np.testing.assert_allclose(_f32(cT_rg), np.asarray(cT_r), atol=1e-4, rtol=1e-4)

    # 3) Performance default: bf16 operands / bf16 xp + out streams, f32 state & gate math.
    layer_bf16 = LSTMLayerPallas(params)   # matmul_dtype=bf16
    out_bf, (hT_bf, cT_bf) = layer_bf16(x, (h0, c0))
    jax.block_until_ready((out_bf, hT_bf, cT_bf))
    assert out_bf.shape == (B, T, H) and hT_bf.shape == (1, B, H) and cT_bf.shape == (1, B, H)
    np.testing.assert_allclose(_f32(out_bf), np.asarray(out_r), atol=5e-2, rtol=5e-2)
    np.testing.assert_allclose(_f32(hT_bf), np.asarray(hT_r), atol=5e-2, rtol=5e-2)
    np.testing.assert_allclose(_f32(cT_bf), np.asarray(cT_r), atol=5e-2, rtol=5e-2)

    print("KERNEL_OK")
</pallas_src>

<mosaic_0001>
module attributes {stable_mosaic.version = 11 : i64} {
  func.func @_lstm_kernel(%arg0: i32, %arg1: memref<8x8x128xf32, #tpu.memory_space<vmem>>, %arg2: memref<8x32xf32, #tpu.memory_space<vmem>>, %arg3: memref<8x32xf32, #tpu.memory_space<vmem>>, %arg4: memref<32x128xf32, #tpu.memory_space<any>>, %arg5: memref<8x8x32xf32, #tpu.memory_space<vmem>>, %arg6: memref<8x32xf32, #tpu.memory_space<vmem>>, %arg7: memref<8x32xf32, #tpu.memory_space<vmem>>, %arg8: memref<8x32xf32, #tpu.memory_space<vmem>>, %arg9: memref<8x32xf32, #tpu.memory_space<vmem>>, %arg10: memref<32x128xf32, #tpu.memory_space<vmem>>, %arg11: memref<!tpu.dma_semaphore, #tpu.memory_space<semaphore_mem>>) attributes {dimension_semantics = [#tpu.dimension_semantics<arbitrary>], iteration_bounds = array<i64: 1>, scalar_prefetch = 0 : i64, scratch_operands = 4 : i64, tpu.core_type = #tpu.core_type<tc>, window_params = [{transform_indices = @transform_0, window_bounds = array<i64: 8, 8, 128>}, {pipeline_mode = #tpu.pipeline_mode<synchronous>, transform_indices = @transform_1, window_bounds = array<i64: 8, 32>}, {pipeline_mode = #tpu.pipeline_mode<synchronous>, transform_indices = @transform_2, window_bounds = array<i64: 8, 32>}, {}, {transform_indices = @transform_4, window_bounds = array<i64: 8, 8, 32>}, {pipeline_mode = #tpu.pipeline_mode<synchronous>, transform_indices = @transform_5, window_bounds = array<i64: 8, 32>}, {pipeline_mode = #tpu.pipeline_mode<synchronous>, transform_indices = @transform_6, window_bounds = array<i64: 8, 32>}]} {
    %c0_i32 = arith.constant 0 : i32
    %0 = arith.cmpi eq, %arg0, %c0_i32 : i32
    %1 = arith.extui %0 : i1 to i32
    %c0_i32_0 = arith.constant 0 : i32
    %2 = arith.cmpi ne, %1, %c0_i32_0 : i32
    scf.if %2 {
      tpu.enqueue_dma source(%arg4 : memref<32x128xf32, #tpu.memory_space<any>>) target(%arg10 : memref<32x128xf32, #tpu.memory_space<vmem>>) target_semaphore(%arg11 : memref<!tpu.dma_semaphore, #tpu.memory_space<semaphore_mem>>)
      tpu.wait_dma2 semaphore(%arg11 : memref<!tpu.dma_semaphore, #tpu.memory_space<semaphore_mem>>) src(%arg4 : memref<32x128xf32, #tpu.memory_space<any>>) dst(%arg10 : memref<32x128xf32, #tpu.memory_space<vmem>>)
      %c0_90 = arith.constant 0 : index
      %c0_91 = arith.constant 0 : index
      %290 = vector.load %arg2[%c0_90, %c0_91] : memref<8x32xf32, #tpu.memory_space<vmem>>, vector<8x32xf32>
      %c0_92 = arith.constant 0 : index
      %c0_93 = arith.constant 0 : index
      %291 = vector.load %arg8[%c0_92, %c0_93] : memref<8x32xf32, #tpu.memory_space<vmem>>, vector<8x32xf32>
      tpu.vector_store %arg8[%c0_92, %c0_93], %290 {strides = array<i32>} : memref<8x32xf32, #tpu.memory_space<vmem>>, vector<8x32xf32>,
      %c0_94 = arith.constant 0 : index
      %c0_95 = arith.constant 0 : index
      %292 = vector.load %arg3[%c0_94, %c0_95] : memref<8x32xf32, #tpu.memory_space<vmem>>, vector<8x32xf32>
      %c0_96 = arith.constant 0 : index
      %c0_97 = arith.constant 0 : index
      %293 = vector.load %arg9[%c0_96, %c0_97] : memref<8x32xf32, #tpu.memory_space<vmem>>, vector<8x32xf32>
      tpu.vector_store %arg9[%c0_96, %c0_97], %292 {strides = array<i32>} : memref<8x32xf32, #tpu.memory_space<vmem>>, vector<8x32xf32>,
    } else {
    }
    %c0 = arith.constant 0 : index
    %c0_1 = arith.constant 0 : index
    %3 = vector.load %arg8[%c0, %c0_1] : memref<8x32xf32, #tpu.memory_space<vmem>>, vector<8x32xf32>
    %c0_2 = arith.constant 0 : index
    %c0_3 = arith.constant 0 : index
    %4 = vector.load %arg9[%c0_2, %c0_3] : memref<8x32xf32, #tpu.memory_space<vmem>>, vector<8x32xf32>
    %c0_i32_4 = arith.constant 0 : i32
    %5 = arith.index_cast %c0_i32_4 : i32 to index
    %c0_5 = arith.constant 0 : index
    %c0_6 = arith.constant 0 : index
    %6 = vector.load %arg1[%5, %c0_5, %c0_6] : memref<8x8x128xf32, #tpu.memory_space<vmem>>, vector<1x8x128xf32>
    %7 = vector.shape_cast %6 : vector<1x8x128xf32> to vector<8x128xf32>
    %c0_7 = arith.constant 0 : index
    %c0_8 = arith.constant 0 : index
    %8 = vector.load %arg10[%c0_7, %c0_8] : memref<32x128xf32, #tpu.memory_space<vmem>>, vector<32x128xf32>
    %cst = arith.constant dense<0.000000e+00> : vector<8x128xf32>
    %9 = tpu.matmul %3, %8, %cst {dimension_numbers = #tpu.dot_dimension_numbers<[1], [0], [0], [1], [0, 0, 1, 1], [], []>} : vector<8x32xf32>, vector<32x128xf32>, vector<8x128xf32> -> vector<8x128xf32>
    %10 = arith.addf %7, %9 : vector<8x128xf32>
    %11 = vector.extract_strided_slice %10 {offsets = [0, 0], sizes = [8, 32], strides = [1, 1]} : vector<8x128xf32> to vector<8x32xf32>
    %12 = arith.negf %11 : vector<8x32xf32>
    %13 = math.exp %12 : vector<8x32xf32>
    %cst_9 = arith.constant 1.000000e+00 : f32
    %14 = vector.broadcast %cst_9 : f32 to vector<8x32xf32>
    %15 = arith.addf %14, %13 : vector<8x32xf32>
    %16 = arith.divf %14, %15 : vector<8x32xf32>
    %17 = vector.extract_strided_slice %10 {offsets = [0, 32], sizes = [8, 32], strides = [1, 1]} : vector<8x128xf32> to vector<8x32xf32>
    %18 = arith.negf %17 : vector<8x32xf32>
    %19 = math.exp %18 : vector<8x32xf32>
    %cst_10 = arith.constant 1.000000e+00 : f32
    %20 = vector.broadcast %cst_10 : f32 to vector<8x32xf32>
    %21 = arith.addf %20, %19 : vector<8x32xf32>
    %22 = arith.divf %20, %21 : vector<8x32xf32>
    %23 = vector.extract_strided_slice %10 {offsets = [0, 64], sizes = [8, 32], strides = [1, 1]} : vector<8x128xf32> to vector<8x32xf32>
    %24 = math.tanh %23 : vector<8x32xf32>
    %25 = vector.extract_strided_slice %10 {offsets = [0, 96], sizes = [8, 32], strides = [1, 1]} : vector<8x128xf32> to vector<8x32xf32>
    %26 = arith.negf %25 : vector<8x32xf32>
    %27 = math.exp %26 : vector<8x32xf32>
    %cst_11 = arith.constant 1.000000e+00 : f32
    %28 = vector.broadcast %cst_11 : f32 to vector<8x32xf32>
    %29 = arith.addf %28, %27 : vector<8x32xf32>
    %30 = arith.divf %28, %29 : vector<8x32xf32>
    %31 = arith.mulf %22, %4 : vector<8x32xf32>
    %32 = arith.mulf %16, %24 : vector<8x32xf32>
    %33 = arith.addf %31, %32 : vector<8x32xf32>
    %34 = math.tanh %33 : vector<8x32xf32>
    %35 = arith.mulf %30, %34 : vector<8x32xf32>
    %36 = arith.index_cast %c0_i32_4 : i32 to index
    %c0_12 = arith.constant 0 : index
    %c0_13 = arith.constant 0 : index
    %37 = vector.load %arg5[%36, %c0_12, %c0_13] : memref<8x8x32xf32, #tpu.memory_space<vmem>>, vector<1x8x32xf32>
    %38 = vector.shape_cast %37 : vector<1x8x32xf32> to vector<8x32xf32>
    %39 = vector.shape_cast %35 : vector<8x32xf32> to vector<1x8x32xf32>
    tpu.vector_store %arg5[%36, %c0_12, %c0_13], %39 {strides = array<i32>} : memref<8x8x32xf32, #tpu.memory_space<vmem>>, vector<1x8x32xf32>,
    %c1_i32 = arith.constant 1 : i32
    %40 = arith.index_cast %c1_i32 : i32 to index
    %c0_14 = arith.constant 0 : index
    %c0_15 = arith.constant 0 : index
    %41 = vector.load %arg1[%40, %c0_14, %c0_15] : memref<8x8x128xf32, #tpu.memory_space<vmem>>, vector<1x8x128xf32>
    %42 = vector.shape_cast %41 : vector<1x8x128xf32> to vector<8x128xf32>
    %c0_16 = arith.constant 0 : index
    %c0_17 = arith.constant 0 : index
    %43 = vector.load %arg10[%c0_16, %c0_17] : memref<32x128xf32, #tpu.memory_space<vmem>>, vector<32x128xf32>
    %cst_18 = arith.constant dense<0.000000e+00> : vector<8x128xf32>
    %44 = tpu.matmul %35, %43, %cst_18 {dimension_numbers = #tpu.dot_dimension_numbers<[1], [0], [0], [1], [0, 0, 1, 1], [], []>} : vector<8x32xf32>, vector<32x128xf32>, vector<8x128xf32> -> vector<8x128xf32>
    %45 = arith.addf %42, %44 : vector<8x128xf32>
    %46 = vector.extract_strided_slice %45 {offsets = [0, 0], sizes = [8, 32], strides = [1, 1]} : vector<8x128xf32> to vector<8x32xf32>
    %47 = arith.negf %46 : vector<8x32xf32>
    %48 = math.exp %47 : vector<8x32xf32>
    %cst_19 = arith.constant 1.000000e+00 : f32
    %49 = vector.broadcast %cst_19 : f32 to vector<8x32xf32>
    %50 = arith.addf %49, %48 : vector<8x32xf32>
    %51 = arith.divf %49, %50 : vector<8x32xf32>
    %52 = vector.extract_strided_slice %45 {offsets = [0, 32], sizes = [8, 32], strides = [1, 1]} : vector<8x128xf32> to vector<8x32xf32>
    %53 = arith.negf %52 : vector<8x32xf32>
    %54 = math.exp %53 : vector<8x32xf32>
    %cst_20 = arith.constant 1.000000e+00 : f32
    %55 = vector.broadcast %cst_20 : f32 to vector<8x32xf32>
    %56 = arith.addf %55, %54 : vector<8x32xf32>
    %57 = arith.divf %55, %56 : vector<8x32xf32>
    %58 = vector.extract_strided_slice %45 {offsets = [0, 64], sizes = [8, 32], strides = [1, 1]} : vector<8x128xf32> to vector<8x32xf32>
    %59 = math.tanh %58 : vector<8x32xf32>
    %60 = vector.extract_strided_slice %45 {offsets = [0, 96], sizes = [8, 32], strides = [1, 1]} : vector<8x128xf32> to vector<8x32xf32>
    %61 = arith.negf %60 : vector<8x32xf32>
    %62 = math.exp %61 : vector<8x32xf32>
    %cst_21 = arith.constant 1.000000e+00 : f32
    %63 = vector.broadcast %cst_21 : f32 to vector<8x32xf32>
    %64 = arith.addf %63, %62 : vector<8x32xf32>
    %65 = arith.divf %63, %64 : vector<8x32xf32>
    %66 = arith.mulf %57, %33 : vector<8x32xf32>
    %67 = arith.mulf %51, %59 : vector<8x32xf32>
    %68 = arith.addf %66, %67 : vector<8x32xf32>
    %69 = math.tanh %68 : vector<8x32xf32>
    %70 = arith.mulf %65, %69 : vector<8x32xf32>
    %71 = arith.index_cast %c1_i32 : i32 to index
    %c0_22 = arith.constant 0 : index
    %c0_23 = arith.constant 0 : index
    %72 = vector.load %arg5[%71, %c0_22, %c0_23] : memref<8x8x32xf32, #tpu.memory_space<vmem>>, vector<1x8x32xf32>
    %73 = vector.shape_cast %72 : vector<1x8x32xf32> to vector<8x32xf32>
    %74 = vector.shape_cast %70 : vector<8x32xf32> to vector<1x8x32xf32>
    tpu.vector_store %arg5[%71, %c0_22, %c0_23], %74 {strides = array<i32>} : memref<8x8x32xf32, #tpu.memory_space<vmem>>, vector<1x8x32xf32>,
    %c2_i32 = arith.constant 2 : i32
    %75 = arith.index_cast %c2_i32 : i32 to index
    %c0_24 = arith.constant 0 : index
    %c0_25 = arith.constant 0 : index
    %76 = vector.load %arg1[%75, %c0_24, %c0_25] : memref<8x8x128xf32, #tpu.memory_space<vmem>>, vector<1x8x128xf32>
    %77 = vector.shape_cast %76 : vector<1x8x128xf32> to vector<8x128xf32>
    %c0_26 = arith.constant 0 : index
    %c0_27 = arith.constant 0 : index
    %78 = vector.load %arg10[%c0_26, %c0_27] : memref<32x128xf32, #tpu.memory_space<vmem>>, vector<32x128xf32>
    %cst_28 = arith.constant dense<0.000000e+00> : vector<8x128xf32>
    %79 = tpu.matmul %70, %78, %cst_28 {dimension_numbers = #tpu.dot_dimension_numbers<[1], [0], [0], [1], [0, 0, 1, 1], [], []>} : vector<8x32xf32>, vector<32x128xf32>, vector<8x128xf32> -> vector<8x128xf32>
    %80 = arith.addf %77, %79 : vector<8x128xf32>
    %81 = vector.extract_strided_slice %80 {offsets = [0, 0], sizes = [8, 32], strides = [1, 1]} : vector<8x128xf32> to vector<8x32xf32>
    %82 = arith.negf %81 : vector<8x32xf32>
    %83 = math.exp %82 : vector<8x32xf32>
    %cst_29 = arith.constant 1.000000e+00 : f32
    %84 = vector.broadcast %cst_29 : f32 to vector<8x32xf32>
    %85 = arith.addf %84, %83 : vector<8x32xf32>
    %86 = arith.divf %84, %85 : vector<8x32xf32>
    %87 = vector.extract_strided_slice %80 {offsets = [0, 32], sizes = [8, 32], strides = [1, 1]} : vector<8x128xf32> to vector<8x32xf32>
    %88 = arith.negf %87 : vector<8x32xf32>
    %89 = math.exp %88 : vector<8x32xf32>
    %cst_30 = arith.constant 1.000000e+00 : f32
    %90 = vector.broadcast %cst_30 : f32 to vector<8x32xf32>
    %91 = arith.addf %90, %89 : vector<8x32xf32>
    %92 = arith.divf %90, %91 : vector<8x32xf32>
    %93 = vector.extract_strided_slice %80 {offsets = [0, 64], sizes = [8, 32], strides = [1, 1]} : vector<8x128xf32> to vector<8x32xf32>
    %94 = math.tanh %93 : vector<8x32xf32>
    %95 = vector.extract_strided_slice %80 {offsets = [0, 96], sizes = [8, 32], strides = [1, 1]} : vector<8x128xf32> to vector<8x32xf32>
    %96 = arith.negf %95 : vector<8x32xf32>
    %97 = math.exp %96 : vector<8x32xf32>
    %cst_31 = arith.constant 1.000000e+00 : f32
    %98 = vector.broadcast %cst_31 : f32 to vector<8x32xf32>
    %99 = arith.addf %98, %97 : vector<8x32xf32>
    %100 = arith.divf %98, %99 : vector<8x32xf32>
    %101 = arith.mulf %92, %68 : vector<8x32xf32>
    %102 = arith.mulf %86, %94 : vector<8x32xf32>
    %103 = arith.addf %101, %102 : vector<8x32xf32>
    %104 = math.tanh %103 : vector<8x32xf32>
    %105 = arith.mulf %100, %104 : vector<8x32xf32>
    %106 = arith.index_cast %c2_i32 : i32 to index
    %c0_32 = arith.constant 0 : index
    %c0_33 = arith.constant 0 : index
    %107 = vector.load %arg5[%106, %c0_32, %c0_33] : memref<8x8x32xf32, #tpu.memory_space<vmem>>, vector<1x8x32xf32>
    %108 = vector.shape_cast %107 : vector<1x8x32xf32> to vector<8x32xf32>
    %109 = vector.shape_cast %105 : vector<8x32xf32> to vector<1x8x32xf32>
    tpu.vector_store %arg5[%106, %c0_32, %c0_33], %109 {strides = array<i32>} : memref<8x8x32xf32, #tpu.memory_space<vmem>>, vector<1x8x32xf32>,
    %c3_i32 = arith.constant 3 : i32
    %110 = arith.index_cast %c3_i32 : i32 to index
    %c0_34 = arith.constant 0 : index
    %c0_35 = arith.constant 0 : index
    %111 = vector.load %arg1[%110, %c0_34, %c0_35] : memref<8x8x128xf32, #tpu.memory_space<vmem>>, vector<1x8x128xf32>
    %112 = vector.shape_cast %111 : vector<1x8x128xf32> to vector<8x128xf32>
    %c0_36 = arith.constant 0 : index
    %c0_37 = arith.constant 0 : index
    %113 = vector.load %arg10[%c0_36, %c0_37] : memref<32x128xf32, #tpu.memory_space<vmem>>, vector<32x128xf32>
    %cst_38 = arith.constant dense<0.000000e+00> : vector<8x128xf32>
    %114 = tpu.matmul %105, %113, %cst_38 {dimension_numbers = #tpu.dot_dimension_numbers<[1], [0], [0], [1], [0, 0, 1, 1], [], []>} : vector<8x32xf32>, vector<32x128xf32>, vector<8x128xf32> -> vector<8x128xf32>
    %115 = arith.addf %112, %114 : vector<8x128xf32>
    %116 = vector.extract_strided_slice %115 {offsets = [0, 0], sizes = [8, 32], strides = [1, 1]} : vector<8x128xf32> to vector<8x32xf32>
    %117 = arith.negf %116 : vector<8x32xf32>
    %118 = math.exp %117 : vector<8x32xf32>
    %cst_39 = arith.constant 1.000000e+00 : f32
    %119 = vector.broadcast %cst_39 : f32 to vector<8x32xf32>
    %120 = arith.addf %119, %118 : vector<8x32xf32>
    %121 = arith.divf %119, %120 : vector<8x32xf32>
    %122 = vector.extract_strided_slice %115 {offsets = [0, 32], sizes = [8, 32], strides = [1, 1]} : vector<8x128xf32> to vector<8x32xf32>
    %123 = arith.negf %122 : vector<8x32xf32>
    %124 = math.exp %123 : vector<8x32xf32>
    %cst_40 = arith.constant 1.000000e+00 : f32
    %125 = vector.broadcast %cst_40 : f32 to vector<8x32xf32>
    %126 = arith.addf %125, %124 : vector<8x32xf32>
    %127 = arith.divf %125, %126 : vector<8x32xf32>
    %128 = vector.extract_strided_slice %115 {offsets = [0, 64], sizes = [8, 32], strides = [1, 1]} : vector<8x128xf32> to vector<8x32xf32>
    %129 = math.tanh %128 : vector<8x32xf32>
    %130 = vector.extract_strided_slice %115 {offsets = [0, 96], sizes = [8, 32], strides = [1, 1]} : vector<8x128xf32> to vector<8x32xf32>
    %131 = arith.negf %130 : vector<8x32xf32>
    %132 = math.exp %131 : vector<8x32xf32>
    %cst_41 = arith.constant 1.000000e+00 : f32
    %133 = vector.broadcast %cst_41 : f32 to vector<8x32xf32>
    %134 = arith.addf %133, %132 : vector<8x32xf32>
    %135 = arith.divf %133, %134 : vector<8x32xf32>
    %136 = arith.mulf %127, %103 : vector<8x32xf32>
    %137 = arith.mulf %121, %129 : vector<8x32xf32>
    %138 = arith.addf %136, %137 : vector<8x32xf32>
    %139 = math.tanh %138 : vector<8x32xf32>
    %140 = arith.mulf %135, %139 : vector<8x32xf32>
    %141 = arith.index_cast %c3_i32 : i32 to index
    %c0_42 = arith.constant 0 : index
    %c0_43 = arith.constant 0 : index
    %142 = vector.load %arg5[%141, %c0_42, %c0_43] : memref<8x8x32xf32, #tpu.memory_space<vmem>>, vector<1x8x32xf32>
    %143 = vector.shape_cast %142 : vector<1x8x32xf32> to vector<8x32xf32>
    %144 = vector.shape_cast %140 : vector<8x32xf32> to vector<1x8x32xf32>
    tpu.vector_store %arg5[%141, %c0_42, %c0_43], %144 {strides = array<i32>} : memref<8x8x32xf32, #tpu.memory_space<vmem>>, vector<1x8x32xf32>,
    %c4_i32 = arith.constant 4 : i32
    %145 = arith.index_cast %c4_i32 : i32 to index
    %c0_44 = arith.constant 0 : index
    %c0_45 = arith.constant 0 : index
    %146 = vector.load %arg1[%145, %c0_44, %c0_45] : memref<8x8x128xf32, #tpu.memory_space<vmem>>, vector<1x8x128xf32>
    %147 = vector.shape_cast %146 : vector<1x8x128xf32> to vector<8x128xf32>
    %c0_46 = arith.constant 0 : index
    %c0_47 = arith.constant 0 : index
    %148 = vector.load %arg10[%c0_46, %c0_47] : memref<32x128xf32, #tpu.memory_space<vmem>>, vector<32x128xf32>
    %cst_48 = arith.constant dense<0.000000e+00> : vector<8x128xf32>
    %149 = tpu.matmul %140, %148, %cst_48 {dimension_numbers = #tpu.dot_dimension_numbers<[1], [0], [0], [1], [0, 0, 1, 1], [], []>} : vector<8x32xf32>, vector<32x128xf32>, vector<8x128xf32> -> vector<8x128xf32>
    %150 = arith.addf %147, %149 : vector<8x128xf32>
    %151 = vector.extract_strided_slice %150 {offsets = [0, 0], sizes = [8, 32], strides = [1, 1]} : vector<8x128xf32> to vector<8x32xf32>
    %152 = arith.negf %151 : vector<8x32xf32>
    %153 = math.exp %152 : vector<8x32xf32>
    %cst_49 = arith.constant 1.000000e+00 : f32
    %154 = vector.broadcast %cst_49 : f32 to vector<8x32xf32>
    %155 = arith.addf %154, %153 : vector<8x32xf32>
    %156 = arith.divf %154, %155 : vector<8x32xf32>
    %157 = vector.extract_strided_slice %150 {offsets = [0, 32], sizes = [8, 32], strides = [1, 1]} : vector<8x128xf32> to vector<8x32xf32>
    %158 = arith.negf %157 : vector<8x32xf32>
    %159 = math.exp %158 : vector<8x32xf32>
    %cst_50 = arith.constant 1.000000e+00 : f32
    %160 = vector.broadcast %cst_50 : f32 to vector<8x32xf32>
    %161 = arith.addf %160, %159 : vector<8x32xf32>
    %162 = arith.divf %160, %161 : vector<8x32xf32>
    %163 = vector.extract_strided_slice %150 {offsets = [0, 64], sizes = [8, 32], strides = [1, 1]} : vector<8x128xf32> to vector<8x32xf32>
    %164 = math.tanh %163 : vector<8x32xf32>
    %165 = vector.extract_strided_slice %150 {offsets = [0, 96], sizes = [8, 32], strides = [1, 1]} : vector<8x128xf32> to vector<8x32xf32>
    %166 = arith.negf %165 : vector<8x32xf32>
    %167 = math.exp %166 : vector<8x32xf32>
    %cst_51 = arith.constant 1.000000e+00 : f32
    %168 = vector.broadcast %cst_51 : f32 to vector<8x32xf32>
    %169 = arith.addf %168, %167 : vector<8x32xf32>
    %170 = arith.divf %168, %169 : vector<8x32xf32>
    %171 = arith.mulf %162, %138 : vector<8x32xf32>
    %172 = arith.mulf %156, %164 : vector<8x32xf32>
    %173 = arith.addf %171, %172 : vector<8x32xf32>
    %174 = math.tanh %173 : vector<8x32xf32>
    %175 = arith.mulf %170, %174 : vector<8x32xf32>
    %176 = arith.index_cast %c4_i32 : i32 to index
    %c0_52 = arith.constant 0 : index
    %c0_53 = arith.constant 0 : index
    %177 = vector.load %arg5[%176, %c0_52, %c0_53] : memref<8x8x32xf32, #tpu.memory_space<vmem>>, vector<1x8x32xf32>
    %178 = vector.shape_cast %177 : vector<1x8x32xf32> to vector<8x32xf32>
    %179 = vector.shape_cast %175 : vector<8x32xf32> to vector<1x8x32xf32>
    tpu.vector_store %arg5[%176, %c0_52, %c0_53], %179 {strides = array<i32>} : memref<8x8x32xf32, #tpu.memory_space<vmem>>, vector<1x8x32xf32>,
    %c5_i32 = arith.constant 5 : i32
    %180 = arith.index_cast %c5_i32 : i32 to index
    %c0_54 = arith.constant 0 : index
    %c0_55 = arith.constant 0 : index
    %181 = vector.load %arg1[%180, %c0_54, %c0_55] : memref<8x8x128xf32, #tpu.memory_space<vmem>>, vector<1x8x128xf32>
    %182 = vector.shape_cast %181 : vector<1x8x128xf32> to vector<8x128xf32>
    %c0_56 = arith.constant 0 : index
    %c0_57 = arith.constant 0 : index
    %183 = vector.load %arg10[%c0_56, %c0_57] : memref<32x128xf32, #tpu.memory_space<vmem>>, vector<32x128xf32>
    %cst_58 = arith.constant dense<0.000000e+00> : vector<8x128xf32>
    %184 = tpu.matmul %175, %183, %cst_58 {dimension_numbers = #tpu.dot_dimension_numbers<[1], [0], [0], [1], [0, 0, 1, 1], [], []>} : vector<8x32xf32>, vector<32x128xf32>, vector<8x128xf32> -> vector<8x128xf32>
    %185 = arith.addf %182, %184 : vector<8x128xf32>
    %186 = vector.extract_strided_slice %185 {offsets = [0, 0], sizes = [8, 32], strides = [1, 1]} : vector<8x128xf32> to vector<8x32xf32>
    %187 = arith.negf %186 : vector<8x32xf32>
    %188 = math.exp %187 : vector<8x32xf32>
    %cst_59 = arith.constant 1.000000e+00 : f32
    %189 = vector.broadcast %cst_59 : f32 to vector<8x32xf32>
    %190 = arith.addf %189, %188 : vector<8x32xf32>
    %191 = arith.divf %189, %190 : vector<8x32xf32>
    %192 = vector.extract_strided_slice %185 {offsets = [0, 32], sizes = [8, 32], strides = [1, 1]} : vector<8x128xf32> to vector<8x32xf32>
    %193 = arith.negf %192 : vector<8x32xf32>
    %194 = math.exp %193 : vector<8x32xf32>
    %cst_60 = arith.constant 1.000000e+00 : f32
    %195 = vector.broadcast %cst_60 : f32 to vector<8x32xf32>
    %196 = arith.addf %195, %194 : vector<8x32xf32>
    %197 = arith.divf %195, %196 : vector<8x32xf32>
    %198 = vector.extract_strided_slice %185 {offsets = [0, 64], sizes = [8, 32], strides = [1, 1]} : vector<8x128xf32> to vector<8x32xf32>
    %199 = math.tanh %198 : vector<8x32xf32>
    %200 = vector.extract_strided_slice %185 {offsets = [0, 96], sizes = [8, 32], strides = [1, 1]} : vector<8x128xf32> to vector<8x32xf32>
    %201 = arith.negf %200 : vector<8x32xf32>
    %202 = math.exp %201 : vector<8x32xf32>
    %cst_61 = arith.constant 1.000000e+00 : f32
    %203 = vector.broadcast %cst_61 : f32 to vector<8x32xf32>
    %204 = arith.addf %203, %202 : vector<8x32xf32>
    %205 = arith.divf %203, %204 : vector<8x32xf32>
    %206 = arith.mulf %197, %173 : vector<8x32xf32>
    %207 = arith.mulf %191, %199 : vector<8x32xf32>
    %208 = arith.addf %206, %207 : vector<8x32xf32>
    %209 = math.tanh %208 : vector<8x32xf32>
    %210 = arith.mulf %205, %209 : vector<8x32xf32>
    %211 = arith.index_cast %c5_i32 : i32 to index
    %c0_62 = arith.constant 0 : index
    %c0_63 = arith.constant 0 : index
    %212 = vector.load %arg5[%211, %c0_62, %c0_63] : memref<8x8x32xf32, #tpu.memory_space<vmem>>, vector<1x8x32xf32>
    %213 = vector.shape_cast %212 : vector<1x8x32xf32> to vector<8x32xf32>
    %214 = vector.shape_cast %210 : vector<8x32xf32> to vector<1x8x32xf32>
    tpu.vector_store %arg5[%211, %c0_62, %c0_63], %214 {strides = array<i32>} : memref<8x8x32xf32, #tpu.memory_space<vmem>>, vector<1x8x32xf32>,
    %c6_i32 = arith.constant 6 : i32
    %215 = arith.index_cast %c6_i32 : i32 to index
    %c0_64 = arith.constant 0 : index
    %c0_65 = arith.constant 0 : index
    %216 = vector.load %arg1[%215, %c0_64, %c0_65] : memref<8x8x128xf32, #tpu.memory_space<vmem>>, vector<1x8x128xf32>
    %217 = vector.shape_cast %216 : vector<1x8x128xf32> to vector<8x128xf32>
    %c0_66 = arith.constant 0 : index
    %c0_67 = arith.constant 0 : index
    %218 = vector.load %arg10[%c0_66, %c0_67] : memref<32x128xf32, #tpu.memory_space<vmem>>, vector<32x128xf32>
    %cst_68 = arith.constant dense<0.000000e+00> : vector<8x128xf32>
    %219 = tpu.matmul %210, %218, %cst_68 {dimension_numbers = #tpu.dot_dimension_numbers<[1], [0], [0], [1], [0, 0, 1, 1], [], []>} : vector<8x32xf32>, vector<32x128xf32>, vector<8x128xf32> -> vector<8x128xf32>
    %220 = arith.addf %217, %219 : vector<8x128xf32>
    %221 = vector.extract_strided_slice %220 {offsets = [0, 0], sizes = [8, 32], strides = [1, 1]} : vector<8x128xf32> to vector<8x32xf32>
    %222 = arith.negf %221 : vector<8x32xf32>
    %223 = math.exp %222 : vector<8x32xf32>
    %cst_69 = arith.constant 1.000000e+00 : f32
    %224 = vector.broadcast %cst_69 : f32 to vector<8x32xf32>
    %225 = arith.addf %224, %223 : vector<8x32xf32>
    %226 = arith.divf %224, %225 : vector<8x32xf32>
    %227 = vector.extract_strided_slice %220 {offsets = [0, 32], sizes = [8, 32], strides = [1, 1]} : vector<8x128xf32> to vector<8x32xf32>
    %228 = arith.negf %227 : vector<8x32xf32>
    %229 = math.exp %228 : vector<8x32xf32>
    %cst_70 = arith.constant 1.000000e+00 : f32
    %230 = vector.broadcast %cst_70 : f32 to vector<8x32xf32>
    %231 = arith.addf %230, %229 : vector<8x32xf32>
    %232 = arith.divf %230, %231 : vector<8x32xf32>
    %233 = vector.extract_strided_slice %220 {offsets = [0, 64], sizes = [8, 32], strides = [1, 1]} : vector<8x128xf32> to vector<8x32xf32>
    %234 = math.tanh %233 : vector<8x32xf32>
    %235 = vector.extract_strided_slice %220 {offsets = [0, 96], sizes = [8, 32], strides = [1, 1]} : vector<8x128xf32> to vector<8x32xf32>
    %236 = arith.negf %235 : vector<8x32xf32>
    %237 = math.exp %236 : vector<8x32xf32>
    %cst_71 = arith.constant 1.000000e+00 : f32
    %238 = vector.broadcast %cst_71 : f32 to vector<8x32xf32>
    %239 = arith.addf %238, %237 : vector<8x32xf32>
    %240 = arith.divf %238, %239 : vector<8x32xf32>
    %241 = arith.mulf %232, %208 : vector<8x32xf32>
    %242 = arith.mulf %226, %234 : vector<8x32xf32>
    %243 = arith.addf %241, %242 : vector<8x32xf32>
    %244 = math.tanh %243 : vector<8x32xf32>
    %245 = arith.mulf %240, %244 : vector<8x32xf32>
    %246 = arith.index_cast %c6_i32 : i32 to index
    %c0_72 = arith.constant 0 : index
    %c0_73 = arith.constant 0 : index
    %247 = vector.load %arg5[%246, %c0_72, %c0_73] : memref<8x8x32xf32, #tpu.memory_space<vmem>>, vector<1x8x32xf32>
    %248 = vector.shape_cast %247 : vector<1x8x32xf32> to vector<8x32xf32>
    %249 = vector.shape_cast %245 : vector<8x32xf32> to vector<1x8x32xf32>
    tpu.vector_store %arg5[%246, %c0_72, %c0_73], %249 {strides = array<i32>} : memref<8x8x32xf32, #tpu.memory_space<vmem>>, vector<1x8x32xf32>,
    %c7_i32 = arith.constant 7 : i32
    %250 = arith.index_cast %c7_i32 : i32 to index
    %c0_74 = arith.constant 0 : index
    %c0_75 = arith.constant 0 : index
    %251 = vector.load %arg1[%250, %c0_74, %c0_75] : memref<8x8x128xf32, #tpu.memory_space<vmem>>, vector<1x8x128xf32>
    %252 = vector.shape_cast %251 : vector<1x8x128xf32> to vector<8x128xf32>
    %c0_76 = arith.constant 0 : index
    %c0_77 = arith.constant 0 : index
    %253 = vector.load %arg10[%c0_76, %c0_77] : memref<32x128xf32, #tpu.memory_space<vmem>>, vector<32x128xf32>
    %cst_78 = arith.constant dense<0.000000e+00> : vector<8x128xf32>
    %254 = tpu.matmul %245, %253, %cst_78 {dimension_numbers = #tpu.dot_dimension_numbers<[1], [0], [0], [1], [0, 0, 1, 1], [], []>} : vector<8x32xf32>, vector<32x128xf32>, vector<8x128xf32> -> vector<8x128xf32>
    %255 = arith.addf %252, %254 : vector<8x128xf32>
    %256 = vector.extract_strided_slice %255 {offsets = [0, 0], sizes = [8, 32], strides = [1, 1]} : vector<8x128xf32> to vector<8x32xf32>
    %257 = arith.negf %256 : vector<8x32xf32>
    %258 = math.exp %257 : vector<8x32xf32>
    %cst_79 = arith.constant 1.000000e+00 : f32
    %259 = vector.broadcast %cst_79 : f32 to vector<8x32xf32>
    %260 = arith.addf %259, %258 : vector<8x32xf32>
    %261 = arith.divf %259, %260 : vector<8x32xf32>
    %262 = vector.extract_strided_slice %255 {offsets = [0, 32], sizes = [8, 32], strides = [1, 1]} : vector<8x128xf32> to vector<8x32xf32>
    %263 = arith.negf %262 : vector<8x32xf32>
    %264 = math.exp %263 : vector<8x32xf32>
    %cst_80 = arith.constant 1.000000e+00 : f32
    %265 = vector.broadcast %cst_80 : f32 to vector<8x32xf32>
    %266 = arith.addf %265, %264 : vector<8x32xf32>
    %267 = arith.divf %265, %266 : vector<8x32xf32>
    %268 = vector.extract_strided_slice %255 {offsets = [0, 64], sizes = [8, 32], strides = [1, 1]} : vector<8x128xf32> to vector<8x32xf32>
    %269 = math.tanh %268 : vector<8x32xf32>
    %270 = vector.extract_strided_slice %255 {offsets = [0, 96], sizes = [8, 32], strides = [1, 1]} : vector<8x128xf32> to vector<8x32xf32>
    %271 = arith.negf %270 : vector<8x32xf32>
    %272 = math.exp %271 : vector<8x32xf32>
    %cst_81 = arith.constant 1.000000e+00 : f32
    %273 = vector.broadcast %cst_81 : f32 to vector<8x32xf32>
    %274 = arith.addf %273, %272 : vector<8x32xf32>
    %275 = arith.divf %273, %274 : vector<8x32xf32>
    %276 = arith.mulf %267, %243 : vector<8x32xf32>
    %277 = arith.mulf %261, %269 : vector<8x32xf32>
    %278 = arith.addf %276, %277 : vector<8x32xf32>
    %279 = math.tanh %278 : vector<8x32xf32>
    %280 = arith.mulf %275, %279 : vector<8x32xf32>
    %281 = arith.index_cast %c7_i32 : i32 to index
    %c0_82 = arith.constant 0 : index
    %c0_83 = arith.constant 0 : index
    %282 = vector.load %arg5[%281, %c0_82, %c0_83] : memref<8x8x32xf32, #tpu.memory_space<vmem>>, vector<1x8x32xf32>
    %283 = vector.shape_cast %282 : vector<1x8x32xf32> to vector<8x32xf32>
    %284 = vector.shape_cast %280 : vector<8x32xf32> to vector<1x8x32xf32>
    tpu.vector_store %arg5[%281, %c0_82, %c0_83], %284 {strides = array<i32>} : memref<8x8x32xf32, #tpu.memory_space<vmem>>, vector<1x8x32xf32>,
    %c8_i32 = arith.constant 8 : i32
    %c0_84 = arith.constant 0 : index
    %c0_85 = arith.constant 0 : index
    %285 = vector.load %arg8[%c0_84, %c0_85] : memref<8x32xf32, #tpu.memory_space<vmem>>, vector<8x32xf32>
    tpu.vector_store %arg8[%c0_84, %c0_85], %280 {strides = array<i32>} : memref<8x32xf32, #tpu.memory_space<vmem>>, vector<8x32xf32>,
    %c0_86 = arith.constant 0 : index
    %c0_87 = arith.constant 0 : index
    %286 = vector.load %arg9[%c0_86, %c0_87] : memref<8x32xf32, #tpu.memory_space<vmem>>, vector<8x32xf32>
    tpu.vector_store %arg9[%c0_86, %c0_87], %278 {strides = array<i32>} : memref<8x32xf32, #tpu.memory_space<vmem>>, vector<8x32xf32>,
    %c0_i32_88 = arith.constant 0 : i32
    %287 = arith.cmpi eq, %arg0, %c0_i32_88 : i32
    %288 = arith.extui %287 : i1 to i32
    %c0_i32_89 = arith.constant 0 : i32
    %289 = arith.cmpi ne, %288, %c0_i32_89 : i32
    scf.if %289 {
      %c0_90 = arith.constant 0 : index
      %c0_91 = arith.constant 0 : index
      %290 = vector.load %arg8[%c0_90, %c0_91] : memref<8x32xf32, #tpu.memory_space<vmem>>, vector<8x32xf32>
      %c0_92 = arith.constant 0 : index
      %c0_93 = arith.constant 0 : index
      %291 = vector.load %arg6[%c0_92, %c0_93] : memref<8x32xf32, #tpu.memory_space<vmem>>, vector<8x32xf32>
      tpu.vector_store %arg6[%c0_92, %c0_93], %290 {strides = array<i32>} : memref<8x32xf32, #tpu.memory_space<vmem>>, vector<8x32xf32>,
      %c0_94 = arith.constant 0 : index
      %c0_95 = arith.constant 0 : index
      %292 = vector.load %arg9[%c0_94, %c0_95] : memref<8x32xf32, #tpu.memory_space<vmem>>, vector<8x32xf32>
      %c0_96 = arith.constant 0 : index
      %c0_97 = arith.constant 0 : index
      %293 = vector.load %arg7[%c0_96, %c0_97] : memref<8x32xf32, #tpu.memory_space<vmem>>, vector<8x32xf32>
      tpu.vector_store %arg7[%c0_96, %c0_97], %292 {strides = array<i32>} : memref<8x32xf32, #tpu.memory_space<vmem>>, vector<8x32xf32>,
    } else {
    }
    return
  }
  func.func @transform_0(%arg0: i32) -> (i32, i32, i32) {
    %c0_i32 = arith.constant 0 : i32
    %c0_i32_0 = arith.constant 0 : i32
    %c0_i32_1 = arith.constant 0 : i32
    return %arg0, %c0_i32, %c0_i32_0 : i32, i32, i32
  }
  func.func @transform_1(%arg0: i32) -> (i32, i32) {
    %c0_i32 = arith.constant 0 : i32
    %c0_i32_0 = arith.constant 0 : i32
    %c0_i32_1 = arith.constant 0 : i32
    return %c0_i32, %c0_i32_0 : i32, i32
  }
  func.func @transform_2(%arg0: i32) -> (i32, i32) {
    %c0_i32 = arith.constant 0 : i32
    %c0_i32_0 = arith.constant 0 : i32
    %c0_i32_1 = arith.constant 0 : i32
    return %c0_i32, %c0_i32_0 : i32, i32
  }
  func.func @transform_4(%arg0: i32) -> (i32, i32, i32) {
    %c0_i32 = arith.constant 0 : i32
    %c0_i32_0 = arith.constant 0 : i32
    %c0_i32_1 = arith.constant 0 : i32
    return %arg0, %c0_i32, %c0_i32_0 : i32, i32, i32
  }
  func.func @transform_5(%arg0: i32) -> (i32, i32) {
    %c0_i32 = arith.constant 0 : i32
    %c0_i32_0 = arith.constant 0 : i32
    %c0_i32_1 = arith.constant 0 : i32
    return %c0_i32, %c0_i32_0 : i32, i32
  }
  func.func @transform_6(%arg0: i32) -> (i32, i32) {
    %c0_i32 = arith.constant 0 : i32
    %c0_i32_0 = arith.constant 0 : i32
    %c0_i32_1 = arith.constant 0 : i32
    return %c0_i32, %c0_i32_0 : i32, i32
  }
}

</mosaic_0001>

<bundles_post_ra>
// kernel: tpu_custom_call.1
= control target key start
LH: loop header
LB: loop body
LE: loop exit
PB: predicated region body
PF: predicated region fallthrough
CT: control target
= control target key end

     0   :  { %12 = vsyncpa [#allocation7], 0  ;;  %s1712_s0 = inlined_call_operand.hbm [shape: f32[8,8,128], index: 0, kind: input, shape index: {}]   ;;  %s1713_s1 = inlined_call_operand.hbm [shape: f32[8,32], index: 1, kind: input, shape index: {}]   ;;  %s1714_s2 = inlined_call_operand.hbm [shape: f32[8,32], index: 2, kind: input, shape index: {}]   ;;  %s1715_s3 = inlined_call_operand.hbm [shape: f32[32,128], index: 3, kind: input, shape index: {}]   ;;  %s1716_s4 = inlined_call_operand.hbm [shape: f32[8,8,32], index: 4, kind: output, shape index: {0}]   ;;  %s1717_s5 = inlined_call_operand.hbm [shape: f32[8,32], index: 5, kind: output, shape index: {1}]   ;;  %s1718_s6 = inlined_call_operand.hbm [shape: f32[8,32], index: 6, kind: output, shape index: {2}]  }
   0x1   :  { %13 = vsyncpa [#allocation10], 0 }
   0x2   :  { %14 = vsyncpa [#allocation8], 0 }
   0x3   :  { %15 = vsyncpa [#allocation14], 0  ;;  %s1458_s21 = smov [#allocation9]   ;;  %s1459_s23 = smov [#allocation6]  }
   0x4   :  { %s34_s22 = sshll.u32 %s1458_s21, 4  ;;  %s21_s24 = sshll.u32 %s1459_s23, 4  ;;  %s35_s22 = int_to_ptr.vmem [resolvable:$true] %s34_s22  ;;  %s1508_s24 = int_to_ptr.vmem [resolvable:$true] %s21_s24 }
   0x5   :  { %s1294_s27 = scalar_lea.hbm %s1713_s1, 128 }
   0x6   :  { %p1295_p0 = scmp.ne.s32.totalorder %s1713_s1, %s1294_s27  ;;  %p1298_p1 = scmp.lt.u32.totalorder %s1294_s27, %s1713_s1 }
   0x8   :  { %p1300_p2 = pnand %p1298_p1, %p1295_p0 }
   0xa   :  { %1303 = shalt.err (!%p1300_p2)
}
   0xb   :  { %s1304_s8 = scalar_lea.vmem %s35_s22, 128  ;;  %p1309_p4 = scmp.lt.s32.totalorder %s35_s22, %s35_s22 }
   0xc   :  { %p1305_p3 = scmp.ne.s32.totalorder %s35_s22, %s1304_s8  ;;  %p1310_p5 = scmp.lt.s32.totalorder %s1304_s8, %s1304_s8 }
   0xe   :  { %p1311_p6 = por %p1310_p5, %p1309_p4 }
  0x10   :  { %p1312_p7 = pnand %p1311_p6, %p1305_p3 }
  0x12   :  { %1315 = shalt.err (!%p1312_p7)
}
  0x13   :  { %37 = dma.hbm_to_vmem [thread:$0]  %s1713_s1, 128, %s35_s22, [#allocation10]  }
  0x14   :  { %s1316_s13 = scalar_lea.hbm %s1712_s0, 1024 }
  0x15   :  { %p1317_p8 = scmp.ne.s32.totalorder %s1712_s0, %s1316_s13  ;;  %p1320_p9 = scmp.lt.u32.totalorder %s1316_s13, %s1712_s0 }
  0x17   :  { %p1322_p10 = pnand %p1320_p9, %p1317_p8 }
  0x19   :  { %1325 = shalt.err (!%p1322_p10)
}
  0x1a   :  { %s1326_s18 = scalar_lea.vmem %s1508_s24, 1024  ;;  %p1331_p12 = scmp.lt.s32.totalorder %s1508_s24, %s1508_s24 }
  0x1b   :  { %p1327_p11 = scmp.ne.s32.totalorder %s1508_s24, %s1326_s18  ;;  %p1332_p13 = scmp.lt.s32.totalorder %s1326_s18, %s1326_s18 }
  0x1d   :  { %p1333_p0 = por %p1332_p13, %p1331_p12 }
  0x1f   :  { %p1334_p1 = pnand %p1333_p0, %p1327_p11 }
  0x21   :  { %1337 = shalt.err (!%p1334_p1)
}
  0x22   :  { %s1460_s1 = smov 128   ;;  %s1461_s19 = smov 8  }
  0x23   :  { %27 = dma.hbm_to_vmem [thread:$0]  %s1712_s0, 1024, %s1508_s24, [#allocation7], %s1460_s1, %s1460_s1, %s1461_s19  }
  0x24   :  { %s1462_s22 = smov [#allocation11]   ;;  %s1338_s27 = scalar_lea.hbm %s1714_s2, 128 }
  0x25   :  { %s44_s23 = sshll.u32 %s1462_s22, 4  ;;  %p1339_p2 = scmp.ne.s32.totalorder %s1714_s2, %s1338_s27  ;;  %s45_s23 = int_to_ptr.vmem [resolvable:$true] %s44_s23 }
  0x26   :  { %p1342_p3 = scmp.lt.u32.totalorder %s1338_s27, %s1714_s2 }
  0x28   :  { %p1344_p4 = pnand %p1342_p3, %p1339_p2 }
  0x2a   :  { %1347 = shalt.err (!%p1344_p4)
}
  0x2b   :  { %s1348_s8 = scalar_lea.vmem %s45_s23, 128  ;;  %p1353_p6 = scmp.lt.s32.totalorder %s45_s23, %s45_s23 }
  0x2c   :  { %p1349_p5 = scmp.ne.s32.totalorder %s45_s23, %s1348_s8  ;;  %p1354_p7 = scmp.lt.s32.totalorder %s1348_s8, %s1348_s8 }
  0x2e   :  { %p1355_p8 = por %p1354_p7, %p1353_p6 }
  0x30   :  { %p1356_p9 = pnand %p1355_p8, %p1349_p5 }
  0x32   :  { %1359 = shalt.err (!%p1356_p9)
}
  0x33   :  { %47 = dma.hbm_to_vmem [thread:$0]  %s1714_s2, 128, %s45_s23, [#allocation10]  }
  0x34   :  { %1448 = dma.done.wait [#allocation7], 1024  }
  0x35   :  { %1449 = vsyncadd [#allocation7], 4294966272 }
  0x36   :  { %1450 = dma.done.wait [#allocation10], 256  }
  0x37   :  { %1451 = vsyncadd [#allocation10], 4294967040  ;;  %s1463_s9 = smov [#allocation4]   ;;  %s1360_s13 = scalar_lea.hbm %s1715_s3, 512 }
  0x38   :  { %s68_s10 = sshll.u32 %s1463_s9, 4  ;;  %p1361_p10 = scmp.ne.s32.totalorder %s1715_s3, %s1360_s13  ;;  %s69_s10 = int_to_ptr.vmem [resolvable:$true] %s68_s10 }
  0x39   :  { %p1364_p11 = scmp.lt.u32.totalorder %s1360_s13, %s1715_s3 }
  0x3b   :  { %p1366_p12 = pnand %p1364_p11, %p1361_p10 }
  0x3d   :  { %1369 = shalt.err (!%p1366_p12)  }
  0x3e   :  { %s1370_s2 = scalar_lea.vmem %s69_s10, 512  ;;  %p1375_p0 = scmp.lt.s32.totalorder %s69_s10, %s69_s10 }
  0x3f   :  { %p1371_p13 = scmp.ne.s32.totalorder %s69_s10, %s1370_s2  ;;  %p1376_p1 = scmp.lt.s32.totalorder %s1370_s2, %s1370_s2 }
  0x41   :  { %p1377_p2 = por %p1376_p1, %p1375_p0 }
  0x43   :  { %p1378_p3 = pnand %p1377_p2, %p1371_p13 }
  0x45   :  { %1381 = shalt.err (!%p1378_p3)  }
  0x46   :  { %71 = dma.hbm_to_vmem [thread:$0]  %s1715_s3, 512, %s69_s10, [#allocation5] }
  0x47   :  { %1452 = dma.done.wait [#allocation5], 512 }
  0x48   :  { %1453 = vsyncadd [#allocation5], 4294966784  ;;  %v1464_v0 = vmov 0.0|0.0   ;;  %vm1465_vm0 = vmmov 0   ;;  %v1466_v1 = vmov 0.0   ;;  %vm76_vm1 = vcmask 261120  }
  0x49   :  { %1167 = vmatprep.subr.bf16.mxu0 %v1464_v0  ;;  %1087 = vmatprep.mubr.msk.f32.mxu0 %vm1465_vm0, %v1466_v1  ;;  %v83_v2 = vld [vmem:[#allocation4] sm:$0xff]  ;;  %v84_v3 = vld [vmem:[#allocation4 + $0x8] sm:$0xff]  ;;  %v85_v4 = vld [vmem:[#allocation4 + $0x10] sm:$0xff]  ;;  %s1467_s3 = smov 64   ;;  %s1468_s21 = smov 32  }
  0x4a   :  { %1173 = vmatprep.subr.bf16.mxu1 %v1464_v0  ;;  %1098 = vmatprep.mubr.msk.f32.mxu1 %vm1465_vm0, %v1466_v1  ;;  %v1572_v5 = vpack.c.bf16 %v84_v3, %v83_v2  ;;  %v86_v6 = vld [vmem:[#allocation4 + $0x18] sm:$0xff]  ;;  %v75_v7 = vld [vmem:[#allocation9] sm:$0xff]  ;;  %v78_v10 = vld [vmem:[#allocation11] sm:$0xff]  ;;  %s1469_s22 = smov 96   ;;  %s1470_s23 = smov [#allocation12]  }
  0x4b   :  { %77 = vst.msk [vmem:[#allocation2] sm:$0xff] %vm76_vm1, %v75_v7  ;;  %v1576_v8 = vpack.c.bf16 %v86_v6, %v85_v4  ;;  %79 = vst.msk [vmem:[#allocation3] sm:$0xff] %vm76_vm1, %v78_v10  ;;  %v82_v11 = vld [vmem:[#allocation6] sm:$0xff]  ;;  %v196_v31 = vld [vmem:[#allocation6 + $0x8] sm:$0xff]  ;;  %s976_s25 = sshll.u32 %s1470_s23, 4  ;;  %s977_s25 = int_to_ptr.vmem [resolvable:$true] %s976_s25 }
  0x4c   :  { %1169 = vmatpush3.bf16.msra.mxu0 %v1572_v5  ;;  %1175 = vmatpush3.bf16.msra.mxu1 %v1572_v5  ;;  %v305_v49 = vld [vmem:[#allocation6 + $0x10] sm:$0xff]  ;;  %v414_v6 = vld [vmem:[#allocation6 + $0x18] sm:$0xff]  ;;  %s1382_s26 = scalar_lea.vmem %s977_s25, 1024  ;;  %p1387_p5 = scmp.lt.s32.totalorder %s977_s25, %s977_s25 }
  0x4d   :  { %1170 = vmatprep.subr.bf16.mxu0 %v1464_v0  ;;  %1176 = vmatprep.subr.bf16.mxu1 %v1464_v0  ;;  %p1383_p4 = scmp.ne.s32.totalorder %s977_s25, %s1382_s26  ;;  %p1388_p6 = scmp.lt.s32.totalorder %s1382_s26, %s1382_s26 }
  0x4f   :  { %p1389_p7 = por %p1388_p6, %p1387_p5 }
  0x50   :  { %1172 = vmatpush3.bf16.msra.mxu0 %v1576_v8  ;;  %1178 = vmatpush3.bf16.msra.mxu1 %v1576_v8 }
  0x51   :  { %1179 = vmatprep.subr.bf16.mxu0 %v1464_v0  ;;  %1185 = vmatprep.subr.bf16.mxu1 %v1464_v0  ;;  %p1390_p8 = pnand %p1389_p7, %p1383_p4 }
  0x52   :  { %v80_v9 = vld [vmem:[#allocation2] sm:$0xff]  ;;  %v81_v16 = vld [vmem:[#allocation3] sm:$0xff] }
  0x53   :  { %1088 = vmatmul.mubr.msk.f32.vlgmr.msra.gmra.mrb[0].mxu0 %vm76_vm1, %v80_v9 }
  0x54   :  { %1181 = vmatpush3.bf16.msra.mxu0 %v1572_v5  ;;  %1109 = vmatprep.mubr.msk.f32.mxu0 %vm1465_vm0, %v1466_v1 }
  0x55   :  { %1182 = vmatprep.subr.bf16.mxu0 %v1464_v0 }
  0x58   :  { %1184 = vmatpush3.bf16.msra.mxu0 %v1576_v8 }
  0x59   :  { %1191 = vmatprep.subr.bf16.mxu0 %v1464_v0 }
 0x126   :  { %v157_v12 = vpop.f32.mrb[0].mxu0 }
 0x127   :  { %v161_v13 = vadd.f32 %v157_v12, %v82_v11  ;;  %v1089_v14 = vpop.f32.mrb[1].mxu0 }
 0x129   :  { %1230 = vtanh.f32 %v161_v13  ;;  %v1023_v17 = vmul.f32 -1.442695, %v161_v13 }
 0x12b   :  { %1232 = vpow2.f32 %v1023_v17 }
 0x133   :  { %v1231_v15 = vpop.eup %1230 }
 0x134   :  { %175 = vrot.lane.b32.xlu0 %v1231_v15, %s1467_s3 }
 0x135   :  { %v1233_v18 = vpop.eup %1232 }
 0x136   :  { %v165_v19 = vadd.f32 1.0, %v1233_v18 }
 0x138   :  { %170 = vrot.lane.b32.xlu0 %v81_v16, %s1468_s21  ;;  %1234 = vrcp.f32 %v165_v19 }
 0x142   :  { %v1235_v20 = vpop.eup %1234 }
 0x1a6   :  { %v176_v21 = vpop.permute.xlu0 %175 }
 0x1a7   :  { %v178_v22 = vmul.f32 %v1235_v20, %v176_v21 }
 0x1a9   :  { %180 = vrot.lane.b32.xlu1 %v178_v22, %s1468_s21 }
 0x1aa   :  { %v171_v23 = vpop.permute.xlu0 %170 }
 0x1ab   :  { %v173_v24 = vmul.f32 %v1235_v20, %v171_v23 }
 0x21b   :  { %v181_v25 = vpop.permute.xlu1 %180 }
 0x21c   :  { %v183_v26 = vadd.f32 %v181_v25, %v173_v24  ;;  %v523_v25 = vld [vmem:[#allocation6 + $0x20] sm:$0xff] }
 0x21e   :  { %1236 = vtanh.f32 %v183_v26 }
 0x228   :  { %v1237_v27 = vpop.eup %1236 }
 0x229   :  { %186 = vrot.lane.b32.xlu1 %v1237_v27, %s1467_s3 }
 0x29b   :  { %v187_v28 = vpop.permute.xlu1 %186 }
 0x29c   :  { %v189_v29 = vmul.f32 %v1235_v20, %v187_v28 }
 0x29e   :  { %191 = vrot.lane.b32.xlu0 %v189_v29, %s1468_s21 }
 0x310   :  { %v192_v30 = vpop.permute.xlu0 %191 }
 0x311   :  { %194 = vst.msk [vmem:[#allocation12] sm:$0xff] %vm76_vm1, %v192_v30  ;;  %1099 = vmatmul.mubr.msk.f32.vlgmr.msra.gmra.mrb[0].mxu1 %vm76_vm1, %v192_v30 }
 0x312   :  { %1187 = vmatpush3.bf16.msra.mxu1 %v1572_v5  ;;  %1120 = vmatprep.mubr.msk.f32.mxu1 %vm1465_vm0, %v1466_v1 }
 0x313   :  { %1188 = vmatprep.subr.bf16.mxu1 %v1464_v0 }
 0x316   :  { %1190 = vmatpush3.bf16.msra.mxu1 %v1576_v8 }
 0x317   :  { %1197 = vmatprep.subr.bf16.mxu1 %v1464_v0 }
 0x3e4   :  { %v269_v32 = vpop.f32.mrb[0].mxu1 }
 0x3e5   :  { %v273_v33 = vadd.f32 %v269_v32, %v196_v31  ;;  %v1100_v34 = vpop.f32.mrb[1].mxu1 }
 0x3e7   :  { %1238 = vtanh.f32 %v273_v33  ;;  %v1025_v36 = vmul.f32 -1.442695, %v273_v33 }
 0x3e9   :  { %1240 = vpow2.f32 %v1025_v36 }
 0x3f1   :  { %v1239_v35 = vpop.eup %1238 }
 0x3f2   :  { %283 = vrot.lane.b32.xlu1 %v1239_v35, %s1467_s3 }
 0x3f3   :  { %v1241_v37 = vpop.eup %1240 }
 0x3f4   :  { %v277_v38 = vadd.f32 1.0, %v1241_v37 }
 0x3f6   :  { %1242 = vrcp.f32 %v277_v38 }
 0x400   :  { %v1243_v39 = vpop.eup %1242 }
 0x401   :  { %v281_v42 = vmul.f32 %v1243_v39, %v183_v26 }
 0x464   :  { %v284_v40 = vpop.permute.xlu1 %283 }
 0x465   :  { %v286_v41 = vmul.f32 %v1243_v39, %v284_v40 }
 0x467   :  { %288 = vrot.lane.b32.xlu0 %v286_v41, %s1468_s21 }
 0x4d9   :  { %v289_v43 = vpop.permute.xlu0 %288 }
 0x4da   :  { %v291_v44 = vadd.f32 %v289_v43, %v281_v42  ;;  %v632_v43 = vld [vmem:[#allocation6 + $0x28] sm:$0xff] }
 0x4dc   :  { %1244 = vtanh.f32 %v291_v44 }
 0x4e6   :  { %v1245_v45 = vpop.eup %1244 }
 0x4e7   :  { %294 = vrot.lane.b32.xlu1 %v1245_v45, %s1467_s3 }
 0x559   :  { %v295_v46 = vpop.permute.xlu1 %294 }
 0x55a   :  { %v297_v47 = vmul.f32 %v1243_v39, %v295_v46 }
 0x55c   :  { %299 = vrot.lane.b32.xlu0 %v297_v47, %s1468_s21 }
 0x5ce   :  { %v300_v48 = vpop.permute.xlu0 %299 }
 0x5cf   :  { %303 = vst.msk [vmem:[#allocation12 + $0x8] sm:$0xff] %vm76_vm1, %v300_v48  ;;  %1110 = vmatmul.mubr.msk.f32.vlgmr.msra.gmra.mrb[2].mxu0 %vm76_vm1, %v300_v48 }
 0x5d0   :  { %1193 = vmatpush3.bf16.msra.mxu0 %v1572_v5  ;;  %1131 = vmatprep.mubr.msk.f32.mxu0 %vm1465_vm0, %v1466_v1 }
 0x5d1   :  { %1194 = vmatprep.subr.bf16.mxu0 %v1464_v0 }
 0x5d4   :  { %1196 = vmatpush3.bf16.msra.mxu0 %v1576_v8 }
 0x5d5   :  { %1203 = vmatprep.subr.bf16.mxu0 %v1464_v0 }
 0x6a2   :  { %v378_v50 = vpop.f32.mrb[2].mxu0 }
 0x6a3   :  { %v382_v51 = vadd.f32 %v378_v50, %v305_v49  ;;  %v1111_v52 = vpop.f32.mrb[3].mxu0 }
 0x6a5   :  { %1246 = vtanh.f32 %v382_v51  ;;  %v1027_v54 = vmul.f32 -1.442695, %v382_v51 }
 0x6a7   :  { %1248 = vpow2.f32 %v1027_v54 }
 0x6af   :  { %v1247_v53 = vpop.eup %1246 }
 0x6b0   :  { %392 = vrot.lane.b32.xlu1 %v1247_v53, %s1467_s3 }
 0x6b1   :  { %v1249_v55 = vpop.eup %1248 }
 0x6b2   :  { %v386_v56 = vadd.f32 1.0, %v1249_v55 }
 0x6b4   :  { %1250 = vrcp.f32 %v386_v56 }
 0x6be   :  { %v1251_v57 = vpop.eup %1250 }
 0x6bf   :  { %v390_v60 = vmul.f32 %v1251_v57, %v291_v44 }
 0x722   :  { %v393_v58 = vpop.permute.xlu1 %392 }
 0x723   :  { %v395_v59 = vmul.f32 %v1251_v57, %v393_v58 }
 0x725   :  { %397 = vrot.lane.b32.xlu0 %v395_v59, %s1468_s21 }
 0x797   :  { %v398_v61 = vpop.permute.xlu0 %397 }
 0x798   :  { %v400_v62 = vadd.f32 %v398_v61, %v390_v60 }
 0x79a   :  { %1252 = vtanh.f32 %v400_v62 }
 0x7a4   :  { %v1253_v63 = vpop.eup %1252 }
 0x7a5   :  { %403 = vrot.lane.b32.xlu1 %v1253_v63, %s1467_s3 }
 0x817   :  { %v404_v2 = vpop.permute.xlu1 %403 }
 0x818   :  { %v406_v3 = vmul.f32 %v1251_v57, %v404_v2  ;;  %v741_v57 = vld [vmem:[#allocation6 + $0x30] sm:$0xff] }
 0x81a   :  { %408 = vrot.lane.b32.xlu0 %v406_v3, %s1468_s21 }
 0x88c   :  { %v409_v4 = vpop.permute.xlu0 %408 }
 0x88d   :  { %412 = vst.msk [vmem:[#allocation12 + $0x10] sm:$0xff] %vm76_vm1, %v409_v4  ;;  %1121 = vmatmul.mubr.msk.f32.vlgmr.msra.gmra.mrb[2].mxu1 %vm76_vm1, %v409_v4 }
 0x88e   :  { %1199 = vmatpush3.bf16.msra.mxu1 %v1572_v5  ;;  %1142 = vmatprep.mubr.msk.f32.mxu1 %vm1465_vm0, %v1466_v1 }
 0x88f   :  { %1200 = vmatprep.subr.bf16.mxu1 %v1464_v0 }
 0x892   :  { %1202 = vmatpush3.bf16.msra.mxu1 %v1576_v8 }
 0x893   :  { %1209 = vmatprep.subr.bf16.mxu1 %v1464_v0 }
 0x960   :  { %v487_v7 = vpop.f32.mrb[2].mxu1 }
 0x961   :  { %v491_v9 = vadd.f32 %v487_v7, %v414_v6  ;;  %v1122_v10 = vpop.f32.mrb[3].mxu1 }
 0x963   :  { %1254 = vtanh.f32 %v491_v9  ;;  %v1029_v12 = vmul.f32 -1.442695, %v491_v9 }
 0x965   :  { %1256 = vpow2.f32 %v1029_v12 }
 0x96d   :  { %v1255_v11 = vpop.eup %1254 }
 0x96e   :  { %501 = vrot.lane.b32.xlu1 %v1255_v11, %s1467_s3 }
 0x96f   :  { %v1257_v13 = vpop.eup %1256 }
 0x970   :  { %v495_v14 = vadd.f32 1.0, %v1257_v13 }
 0x972   :  { %1258 = vrcp.f32 %v495_v14 }
 0x97c   :  { %v1259_v15 = vpop.eup %1258 }
 0x97d   :  { %v499_v18 = vmul.f32 %v1259_v15, %v400_v62 }
 0x9e0   :  { %v502_v16 = vpop.permute.xlu1 %501 }
 0x9e1   :  { %v504_v17 = vmul.f32 %v1259_v15, %v502_v16 }
 0x9e3   :  { %506 = vrot.lane.b32.xlu0 %v504_v17, %s1468_s21 }
 0xa55   :  { %v507_v19 = vpop.permute.xlu0 %506 }
 0xa56   :  { %v509_v20 = vadd.f32 %v507_v19, %v499_v18 }
 0xa58   :  { %1260 = vtanh.f32 %v509_v20 }
 0xa62   :  { %v1261_v21 = vpop.eup %1260 }
 0xa63   :  { %512 = vrot.lane.b32.xlu1 %v1261_v21, %s1467_s3 }
 0xad5   :  { %v513_v22 = vpop.permute.xlu1 %512 }
 0xad6   :  { %v515_v23 = vmul.f32 %v1259_v15, %v513_v22  ;;  %v850_v15 = vld [vmem:[#allocation6 + $0x38] sm:$0xff] }
 0xad8   :  { %517 = vrot.lane.b32.xlu0 %v515_v23, %s1468_s21 }
 0xb4a   :  { %v518_v24 = vpop.permute.xlu0 %517 }
 0xb4b   :  { %521 = vst.msk [vmem:[#allocation12 + $0x18] sm:$0xff] %vm76_vm1, %v518_v24  ;;  %1132 = vmatmul.mubr.msk.f32.vlgmr.msra.gmra.mrb[4].mxu0 %vm76_vm1, %v518_v24 }
 0xb4c   :  { %1205 = vmatpush3.bf16.msra.mxu0 %v1572_v5  ;;  %1153 = vmatprep.mubr.msk.f32.mxu0 %vm1465_vm0, %v1466_v1 }
 0xb4d   :  { %1206 = vmatprep.subr.bf16.mxu0 %v1464_v0 }
 0xb50   :  { %1208 = vmatpush3.bf16.msra.mxu0 %v1576_v8 }
 0xc1e   :  { %v596_v26 = vpop.f32.mrb[4].mxu0 }
 0xc1f   :  { %v600_v27 = vadd.f32 %v596_v26, %v523_v25  ;;  %v1133_v28 = vpop.f32.mrb[5].mxu0 }
 0xc21   :  { %1262 = vtanh.f32 %v600_v27  ;;  %v1031_v30 = vmul.f32 -1.442695, %v600_v27 }
 0xc23   :  { %1264 = vpow2.f32 %v1031_v30 }
 0xc2b   :  { %v1263_v29 = vpop.eup %1262 }
 0xc2c   :  { %610 = vrot.lane.b32.xlu1 %v1263_v29, %s1467_s3 }
 0xc2d   :  { %v1265_v31 = vpop.eup %1264 }
 0xc2e   :  { %v604_v32 = vadd.f32 1.0, %v1265_v31 }
 0xc30   :  { %1266 = vrcp.f32 %v604_v32 }
 0xc3a   :  { %v1267_v33 = vpop.eup %1266 }
 0xc3b   :  { %v608_v36 = vmul.f32 %v1267_v33, %v509_v20 }
 0xc9e   :  { %v611_v34 = vpop.permute.xlu1 %610 }
 0xc9f   :  { %v613_v35 = vmul.f32 %v1267_v33, %v611_v34 }
 0xca1   :  { %615 = vrot.lane.b32.xlu0 %v613_v35, %s1468_s21 }
 0xd13   :  { %v616_v37 = vpop.permute.xlu0 %615 }
 0xd14   :  { %v618_v38 = vadd.f32 %v616_v37, %v608_v36 }
 0xd16   :  { %1268 = vtanh.f32 %v618_v38 }
 0xd20   :  { %v1269_v39 = vpop.eup %1268 }
 0xd21   :  { %621 = vrot.lane.b32.xlu1 %v1269_v39, %s1467_s3 }
 0xd93   :  { %v622_v40 = vpop.permute.xlu1 %621 }
 0xd94   :  { %v624_v41 = vmul.f32 %v1267_v33, %v622_v40 }
 0xd96   :  { %626 = vrot.lane.b32.xlu0 %v624_v41, %s1468_s21 }
 0xe08   :  { %v627_v42 = vpop.permute.xlu0 %626 }
 0xe09   :  { %630 = vst.msk [vmem:[#allocation12 + $0x20] sm:$0xff] %vm76_vm1, %v627_v42  ;;  %1143 = vmatmul.mubr.msk.f32.vlgmr.msra.gmra.mrb[4].mxu1 %vm76_vm1, %v627_v42 }
 0xe0a   :  { %1211 = vmatpush3.bf16.msra.mxu1 %v1572_v5  ;;  %1164 = vmatprep.mubr.msk.f32.mxu1 %vm1465_vm0, %v1466_v1 }
 0xe0b   :  { %1212 = vmatprep.subr.bf16.mxu1 %v1464_v0 }
 0xe0e   :  { %1214 = vmatpush3.bf16.msra.mxu1 %v1576_v8 }
 0xedc   :  { %v705_v44 = vpop.f32.mrb[4].mxu1 }
 0xedd   :  { %v709_v45 = vadd.f32 %v705_v44, %v632_v43  ;;  %v1144_v46 = vpop.f32.mrb[5].mxu1 }
 0xedf   :  { %1270 = vtanh.f32 %v709_v45  ;;  %v1033_v48 = vmul.f32 -1.442695, %v709_v45 }
 0xee1   :  { %1272 = vpow2.f32 %v1033_v48 }
 0xee9   :  { %v1271_v47 = vpop.eup %1270 }
 0xeea   :  { %719 = vrot.lane.b32.xlu1 %v1271_v47, %s1467_s3 }
 0xeeb   :  { %v1273_v49 = vpop.eup %1272 }
 0xeec   :  { %v713_v50 = vadd.f32 1.0, %v1273_v49 }
 0xeee   :  { %1274 = vrcp.f32 %v713_v50 }
 0xef8   :  { %v1275_v5 = vpop.eup %1274 }
 0xef9   :  { %v717_v0 = vmul.f32 %v1275_v5, %v618_v38 }
 0xf5c   :  { %v720_v51 = vpop.permute.xlu1 %719 }
 0xf5d   :  { %v722_v1 = vmul.f32 %v1275_v5, %v720_v51 }
 0xf5f   :  { %724 = vrot.lane.b32.xlu0 %v722_v1, %s1468_s21 }
 0xfd1   :  { %v725_v8 = vpop.permute.xlu0 %724 }
 0xfd2   :  { %v727_v52 = vadd.f32 %v725_v8, %v717_v0 }
 0xfd4   :  { %1276 = vtanh.f32 %v727_v52 }
 0xfde   :  { %v1277_v53 = vpop.eup %1276 }
 0xfdf   :  { %730 = vrot.lane.b32.xlu1 %v1277_v53, %s1467_s3 }
0x1051   :  { %v731_v54 = vpop.permute.xlu1 %730 }
0x1052   :  { %v733_v55 = vmul.f32 %v1275_v5, %v731_v54 }
0x1054   :  { %735 = vrot.lane.b32.xlu0 %v733_v55, %s1468_s21 }
0x10c6   :  { %v736_v56 = vpop.permute.xlu0 %735 }
0x10c7   :  { %739 = vst.msk [vmem:[#allocation12 + $0x28] sm:$0xff] %vm76_vm1, %v736_v56  ;;  %1154 = vmatmul.mubr.msk.f32.vlgmr.msra.gmra.mrb[6].mxu0 %vm76_vm1, %v736_v56 }
0x119a   :  { %v814_v58 = vpop.f32.mrb[6].mxu0 }
0x119b   :  { %v818_v59 = vadd.f32 %v814_v58, %v741_v57  ;;  %v1155_v60 = vpop.f32.mrb[7].mxu0 }
0x119d   :  { %1278 = vtanh.f32 %v818_v59  ;;  %v1035_v62 = vmul.f32 -1.442695, %v818_v59 }
0x119f   :  { %1280 = vpow2.f32 %v1035_v62 }
0x11a7   :  { %v1279_v61 = vpop.eup %1278 }
0x11a8   :  { %828 = vrot.lane.b32.xlu1 %v1279_v61, %s1467_s3 }
0x11a9   :  { %v1281_v63 = vpop.eup %1280 }
0x11aa   :  { %v822_v2 = vadd.f32 1.0, %v1281_v63 }
0x11ac   :  { %1282 = vrcp.f32 %v822_v2 }
0x11b6   :  { %v1283_v3 = vpop.eup %1282 }
0x11b7   :  { %v826_v7 = vmul.f32 %v1283_v3, %v727_v52 }
0x121a   :  { %v829_v4 = vpop.permute.xlu1 %828 }
0x121b   :  { %v831_v6 = vmul.f32 %v1283_v3, %v829_v4 }
0x121d   :  { %833 = vrot.lane.b32.xlu0 %v831_v6, %s1468_s21 }
0x128f   :  { %v834_v9 = vpop.permute.xlu0 %833 }
0x1290   :  { %v836_v10 = vadd.f32 %v834_v9, %v826_v7 }
0x1292   :  { %1284 = vtanh.f32 %v836_v10 }
0x129c   :  { %v1285_v11 = vpop.eup %1284 }
0x129d   :  { %839 = vrot.lane.b32.xlu1 %v1285_v11, %s1467_s3 }
0x130f   :  { %v840_v12 = vpop.permute.xlu1 %839 }
0x1310   :  { %v842_v13 = vmul.f32 %v1283_v3, %v840_v12 }
0x1312   :  { %844 = vrot.lane.b32.xlu0 %v842_v13, %s1468_s21 }
0x1384   :  { %v845_v14 = vpop.permute.xlu0 %844 }
0x1385   :  { %848 = vst.msk [vmem:[#allocation12 + $0x30] sm:$0xff] %vm76_vm1, %v845_v14  ;;  %1165 = vmatmul.mubr.msk.f32.vlgmr.msra.gmra.mrb[6].mxu1 %vm76_vm1, %v845_v14 }
0x1458   :  { %v923_v16 = vpop.f32.mrb[6].mxu1 }
0x1459   :  { %v927_v17 = vadd.f32 %v923_v16, %v850_v15  ;;  %v1166_v18 = vpop.f32.mrb[7].mxu1 }
0x145b   :  { %1286 = vtanh.f32 %v927_v17  ;;  %v1037_v20 = vmul.f32 -1.442695, %v927_v17 }
0x145d   :  { %1288 = vpow2.f32 %v1037_v20 }
0x1465   :  { %v1287_v19 = vpop.eup %1286 }
0x1466   :  { %937 = vrot.lane.b32.xlu1 %v1287_v19, %s1467_s3 }
0x1467   :  { %v1289_v21 = vpop.eup %1288 }
0x1468   :  { %v931_v22 = vadd.f32 1.0, %v1289_v21 }
0x146a   :  { %1290 = vrcp.f32 %v931_v22 }
0x1474   :  { %v1291_v23 = vpop.eup %1290 }
0x1475   :  { %v935_v26 = vmul.f32 %v1291_v23, %v836_v10 }
0x14d8   :  { %v938_v24 = vpop.permute.xlu1 %937 }
0x14d9   :  { %v940_v25 = vmul.f32 %v1291_v23, %v938_v24 }
0x14db   :  { %942 = vrot.lane.b32.xlu0 %v940_v25, %s1468_s21 }
0x154d   :  { %v943_v27 = vpop.permute.xlu0 %942 }
0x154e   :  { %v945_v28 = vadd.f32 %v943_v27, %v935_v26 }
0x1550   :  { %1292 = vtanh.f32 %v945_v28 }
0x155a   :  { %v1293_v29 = vpop.eup %1292 }
0x155b   :  { %948 = vrot.lane.b32.xlu1 %v1293_v29, %s1467_s3 }
0x155f   :  { %960 = vrot.lane.b32.xlu1 %v945_v28, %s1469_s22 }
0x15cd   :  { %v949_v30 = vpop.permute.xlu1 %948 }
0x15ce   :  { %v951_v31 = vmul.f32 %v1291_v23, %v949_v30 }
0x15d0   :  { %953 = vrot.lane.b32.xlu0 %v951_v31, %s1468_s21 }
0x15d1   :  { %v961_v32 = vpop.permute.xlu1 %960 }
0x15d2   :  { %963 = vst.msk [vmem:[#allocation3] sm:$0xff] %vm76_vm1, %v961_v32 }
0x15d9   :  { %v969_v33 = vld [vmem:[#allocation3] sm:$0xff] }
0x15da   :  { %970 = vst.msk [vmem:[#allocation15] sm:$0xff] %vm76_vm1, %v969_v33 }
0x1642   :  { %v954_v34 = vpop.permute.xlu0 %953 }
0x1643   :  { %957 = vst.msk [vmem:[#allocation12 + $0x38] sm:$0xff] %vm76_vm1, %v954_v34  ;;  %958 = vst.msk [vmem:[#allocation2] sm:$0xff] %vm76_vm1, %v954_v34 }
0x1644   :  { %1393 = shalt.err (!%p1390_p8)
}
0x1645   :  { %s1394_s29 = scalar_lea.hbm %s1716_s4, 1024 }
0x1646   :  { %p1395_p9 = scmp.ne.s32.totalorder %s1716_s4, %s1394_s29  ;;  %p1398_p10 = scmp.lt.u32.totalorder %s1394_s29, %s1716_s4 }
0x1648   :  { %p1400_p11 = pnand %p1398_p10, %p1395_p9 }
0x164a   :  { %1403 = shalt.err (!%p1400_p11)
}
0x164b   :  { %982 = dma.vmem_to_hbm [thread:$0]  %s977_s25, 1024, %s1716_s4, [#allocation8], %s1460_s1, %s1460_s1, %s1461_s19   ;;  %v967_v35 = vld [vmem:[#allocation2] sm:$0xff] }
0x164c   :  { %s1471_s10 = smov [#allocation13]   ;;  %s1472_s12 = smov [#allocation15]   ;;  %968 = vst.msk [vmem:[#allocation13] sm:$0xff] %vm76_vm1, %v967_v35 }
0x164d   :  { %s989_s11 = sshll.u32 %s1471_s10, 4  ;;  %s999_s13 = sshll.u32 %s1472_s12, 4  ;;  %s990_s11 = int_to_ptr.vmem [resolvable:$true] %s989_s11  ;;  %s1000_s13 = int_to_ptr.vmem [resolvable:$true] %s999_s13 }
0x164e   :  { %s1404_s14 = scalar_lea.vmem %s990_s11, 128  ;;  %p1409_p13 = scmp.lt.s32.totalorder %s990_s11, %s990_s11 }
0x164f   :  { %p1405_p12 = scmp.ne.s32.totalorder %s990_s11, %s1404_s14  ;;  %p1410_p0 = scmp.lt.s32.totalorder %s1404_s14, %s1404_s14 }
0x1651   :  { %p1411_p1 = por %p1410_p0, %p1409_p13 }
0x1653   :  { %p1412_p2 = pnand %p1411_p1, %p1405_p12 }
0x1655   :  { %1415 = shalt.err (!%p1412_p2)
}
0x1656   :  { %s1416_s4 = scalar_lea.hbm %s1717_s5, 128 }
0x1657   :  { %p1417_p3 = scmp.ne.s32.totalorder %s1717_s5, %s1416_s4  ;;  %p1420_p4 = scmp.lt.u32.totalorder %s1416_s4, %s1717_s5 }
0x1659   :  { %p1422_p5 = pnand %p1420_p4, %p1417_p3 }
0x165b   :  { %1425 = shalt.err (!%p1422_p5)
}
0x165c   :  { %992 = dma.vmem_to_hbm [thread:$0]  %s990_s11, 128, %s1717_s5, [#allocation14]  }
0x165d   :  { %s1426_s3 = scalar_lea.vmem %s1000_s13, 128  ;;  %p1431_p7 = scmp.lt.s32.totalorder %s1000_s13, %s1000_s13 }
0x165e   :  { %p1427_p6 = scmp.ne.s32.totalorder %s1000_s13, %s1426_s3  ;;  %p1432_p8 = scmp.lt.s32.totalorder %s1426_s3, %s1426_s3 }
0x1660   :  { %p1433_p9 = por %p1432_p8, %p1431_p7 }
0x1662   :  { %p1434_p10 = pnand %p1433_p9, %p1427_p6 }
0x1664   :  { %1437 = shalt.err (!%p1434_p10)
}
0x1665   :  { %s1438_s23 = scalar_lea.hbm %s1718_s6, 128 }
0x1666   :  { %p1439_p11 = scmp.ne.s32.totalorder %s1718_s6, %s1438_s23  ;;  %p1442_p12 = scmp.lt.u32.totalorder %s1438_s23, %s1718_s6 }
0x1668   :  { %p1444_p13 = pnand %p1442_p12, %p1439_p11 }
0x166a   :  { %1447 = shalt.err (!%p1444_p13)
}
0x166b   :  { %1002 = dma.vmem_to_hbm [thread:$0]  %s1000_s13, 128, %s1718_s6, [#allocation14]  }
0x166c   :  { %1454 = dma.done.wait [#allocation8], 1024  }
0x166d   :  { %1455 = vsyncadd [#allocation8], 4294966272 }
0x166e   :  { %1456 = dma.done.wait [#allocation14], 256  }
0x166f   :  { %1457 = vsyncadd [#allocation14], 4294967040 }
0x1670   :  { %1012 = vsyncpa [#allocation7], 1 }
0x1671   :  { %1013 = vsyncpa [#allocation10], 1 }
0x1672   :  { %1014 = vsyncpa [#allocation8], 1 }
0x1673   :  { %1015 = vsyncpa [#allocation14], 1 }
0x1674   :  { %1016 = vsyncmov [#allocation5] }
0x1677   :  { %s1017_s30 = vpop.sfrf %1016 }
0x1678   :  { %p1038_p0 = scmp.ne.s32.totalorder %s1017_s30, 0 }
0x167a   :  { %1021 = shalt.err (%p1038_p0)  }

</bundles_post_ra>
